<compile_context>
chip_gen: v6e
topology: v6e:2x2x1
jax: 0.10.0
libtpu: 0.0.40
codegen_flags: <defaults>
</compile_context>

<pallas_src>
import jax
import jax.numpy as jnp
from jax.experimental import pallas as pl
from jax.experimental.pallas import tpu as pltpu


# ---------------------------------------------------------------------------
# Faithful forward: the module returns its input unchanged.  No pallas_call —
# launching a copy kernel here would only add 2*(B*S*H*itemsize) of HBM traffic
# for zero semantic value.
# ---------------------------------------------------------------------------
def esm2_15b_classifier_forward(x):
    """Esm2_15BClassifier.forward(x) == x (identity pass-through)."""
    return x


# ---------------------------------------------------------------------------
# Optional materialized identity copy (only if a new output buffer is needed,
# e.g. to satisfy a buffer/donation contract).  Tiled, pipelined VMEM copy.
# ---------------------------------------------------------------------------
def _identity_copy_kernel(x_ref, o_ref):
    # Hot path: full-tile load + store.
    o_ref[...] = x_ref[...]


def _pick_seq_tile(S, H, itemsize, target_tile_bytes):
    """Largest seq tile (multiple of 8, dividing S) under the byte budget.

    Falls back to the full seq extent when the slab already fits the budget or
    when no legal divisor exists (full-extent blocks are always legal w.r.t.
    the (8, 128) tiling constraint).
    """
    if S * H * itemsize <= target_tile_bytes:
        return S
    ts = (target_tile_bytes // (H * itemsize)) // 8 * 8
    ts = int(max(8, min(ts, S)))
    while ts > 8 and S % ts != 0:
        ts -= 8
    if ts < 8 or S % ts != 0:
        return S
    return ts


def esm2_15b_identity_copy(x, *, target_tile_bytes=2 << 20):
    """Materialize a copy of x via a tiled Pallas kernel (identity semantics).

    Tiles are ~target_tile_bytes each; with one input and one output, each
    double-buffered, the VMEM footprint is ~4 * target_tile_bytes (default
    ~8 MiB), which fits every generation's scoped VMEM default.
    """
    B, S, H = x.shape
    itemsize = jnp.dtype(x.dtype).itemsize
    ts = _pick_seq_tile(S, H, itemsize, target_tile_bytes)
    grid = (B, S // ts)

    # NOTE: H should be a multiple of 128 (lane-dense stores) for real ESM-2
    # shapes (H=5120).  A block whose last dim equals the full array dim (as in
    # the toy test, H=32) is still legal, just lane-sparse.
    spec = pl.BlockSpec((1, ts, H), lambda b, s: (b, s, 0))

    return pl.pallas_call(
        _identity_copy_kernel,
        out_shape=jax.ShapeDtypeStruct((B, S, H), x.dtype),
        grid_spec=pltpu.PrefetchScalarGridSpec(
            num_scalar_prefetch=0,
            grid=grid,
            in_specs=[spec],
            out_specs=spec,
        ),
        compiler_params=pltpu.CompilerParams(
            # Both axes independent -> shard across v7x's 2 TensorCores;
            # measured neutral on single-TC v5e/v6e.
            dimension_semantics=("parallel", "parallel"),
            # Explicit headroom; ~8 MiB actual footprint stays well under this
            # on v5e/v6e/v7x.
            vmem_limit_bytes=32 << 20,
        ),
    )(x)


# ---------------------------------------------------------------------------
# Stand-in for the (unused) ESM-2 15B backbone constructed in __init__.
# TODO(synk): the frozen EsmModel backbone plays no role in forward(), so no
# Pallas compute is emitted for it.
# ---------------------------------------------------------------------------
def make_unused_backbone_params(hidden=32, vocab=16):
    key = jax.random.PRNGKey(42)
    return {"embed_tokens": jax.random.normal(key, (vocab, hidden), jnp.float32)}


if __name__ == "__main__":
    _ = make_unused_backbone_params()  # constructed, never used (matches forward)

    key = jax.random.PRNGKey(0)
    k0, k1 = jax.random.split(key)

    # --- Test 1: small shape consistent with a token-representation input ---
    x = jax.random.normal(k0, (2, 8, 32), dtype=jnp.float32)

    # Faithful forward: pure pass-through (no HBM traffic, no kernel launch).
    y_fast = esm2_15b_classifier_forward(x)
    assert y_fast.shape == x.shape and y_fast.dtype == x.dtype
    assert bool(jnp.array_equal(y_fast, x))

    # Materialized Pallas copy (single full-extent tile path).
    y_copy = jax.block_until_ready(esm2_15b_identity_copy(x))
    assert y_copy.shape == x.shape and y_copy.dtype == x.dtype
    assert bool(jnp.array_equal(y_copy, x))

    # --- Test 2: exercise the multi-tile (seq-split) path with lane-dense H ---
    x2 = jax.random.normal(k1, (2, 32, 256), dtype=jnp.float32)
    # Tiny byte budget forces ts=8 -> grid (2, 4); block (1, 8, 256) satisfies
    # the (8, 128) constraint.
    y2 = jax.block_until_ready(
        esm2_15b_identity_copy(x2, target_tile_bytes=8 << 10)
    )
    assert y2.shape == x2.shape and y2.dtype == x2.dtype
    assert bool(jnp.array_equal(y2, x2))

    print("KERNEL_OK")
</pallas_src>

<mosaic_0001>
module attributes {stable_mosaic.version = 11 : i64} {
  func.func @_identity_copy_kernel(%arg0: i32, %arg1: i32, %arg2: memref<1x8x32xf32, #tpu.memory_space<vmem>>, %arg3: memref<1x8x32xf32, #tpu.memory_space<vmem>>) attributes {dimension_semantics = [#tpu.dimension_semantics<parallel>, #tpu.dimension_semantics<parallel>], iteration_bounds = array<i64: 2, 1>, scalar_prefetch = 0 : i64, scratch_operands = 0 : i64, tpu.core_type = #tpu.core_type<tc>, window_params = [{transform_indices = @transform_0, window_bounds = array<i64: 1, 8, 32>}, {transform_indices = @transform_1, window_bounds = array<i64: 1, 8, 32>}]} {
    %c0 = arith.constant 0 : index
    %c0_0 = arith.constant 0 : index
    %c0_1 = arith.constant 0 : index
    %0 = vector.load %arg2[%c0, %c0_0, %c0_1] : memref<1x8x32xf32, #tpu.memory_space<vmem>>, vector<1x8x32xf32>
    %c0_2 = arith.constant 0 : index
    %c0_3 = arith.constant 0 : index
    %c0_4 = arith.constant 0 : index
    %1 = vector.load %arg3[%c0_2, %c0_3, %c0_4] : memref<1x8x32xf32, #tpu.memory_space<vmem>>, vector<1x8x32xf32>
    tpu.vector_store %arg3[%c0_2, %c0_3, %c0_4], %0 {strides = array<i32>} : memref<1x8x32xf32, #tpu.memory_space<vmem>>, vector<1x8x32xf32>,
    return
  }
  func.func @transform_0(%arg0: i32, %arg1: i32) -> (i32, i32, i32) {
    %c0_i32 = arith.constant 0 : i32
    %c0_i32_0 = arith.constant 0 : i32
    return %arg0, %arg1, %c0_i32 : i32, i32, i32
  }
  func.func @transform_1(%arg0: i32, %arg1: i32) -> (i32, i32, i32) {
    %c0_i32 = arith.constant 0 : i32
    %c0_i32_0 = arith.constant 0 : i32
    return %arg0, %arg1, %c0_i32 : i32, i32, i32
  }
}

</mosaic_0001>

<bundles_post_ra>
// kernel: tpu_custom_call.1
= control target key start
LH: loop header
LB: loop body
LE: loop exit
PB: predicated region body
PF: predicated region fallthrough
CT: control target
= control target key end

     0   :  { %6 = vsyncpa [#allocation3], 0  ;;  %s584_s0 = inlined_call_operand.hbm [shape: f32[2,8,32], index: 0, kind: input, shape index: {}]   ;;  %s585_s1 = inlined_call_operand.hbm [shape: f32[2,8,32], index: 1, kind: output, shape index: {}]  }
   0x1   :  { %8 = vsyncpa [#allocation3 + $0x1], 0 }
   0x2   :  { %9 = vsyncpa [#allocation4], 0 }
   0x3   :  { %11 = vsyncpa [#allocation4 + $0x1], 0  ;;  %s444_s6 = smov 0   ;;  %s446_s7 = smov 0  }
   0x4   :  { %s448_s8 = smov 0   ;;  %s450_s9 = smov 0  }
   0x5   :  { %s452_s10 = smov 0   ;;  %s454_s11 = smov 0  }
   0x6 LB: > { %s247_s12 = sadd.s32 4294967295, %s430_s11   ;;  %s248_s13 = sadd.s32 4294967294, %s430_s11   ;;  %s430_s11 = sphi %s454_s11, %s17_s11   ;;  %s426_s10 = sphi %s452_s10, %s597_s10   ;;  %s422_s9 = sphi %s450_s9, %s596_s9   ;;  %s418_s8 = sphi %s448_s8, %s595_s8   ;;  %s414_s7 = sphi %s446_s7, %s594_s7   ;;  %s410_s6 = sphi %s444_s6, %s593_s6  }
   0x7   : > { %s29_s14 = sadd.s32 1, %s426_s10  ;;  %s38_s15 = sadd.s32 1, %s418_s8 }
   0x8   : > { %p31_p0 = scmp.ge.s32.totalorder %s29_s14, 2  ;;  %p45_p1 = scmp.ne.s32.totalorder %s418_s8, %s414_s7 }
   0x9   : > { %p46_p2 = scmp.eq.s32.totalorder %s430_s11, 0  ;;  %p51_p3 = scmp.ne.s32.totalorder %s414_s7, %s410_s6 }
   0xa   : > { %s599_s14 = smov (%p31_p0, %s29_s14), 0  ;;  %p52_p5 = scmp.eq.s32.totalorder %s247_s12, 0 }
   0xb   : > { %p485_p4 = por %p46_p2, %p45_p1  ;;  %s33_s17 = ssub.s32 %s426_s10, %s599_s14 }
   0xc   : > { %p77_p6 = scmp.eq.s32.totalorder %s247_s12, 1  ;;  %p36_p7 = scmp.eq.s32.totalorder %s33_s17, 0 }
   0xd   : > { %p491_p8 = por %p52_p5, %p51_p3  ;;  %p83_p10 = scmp.eq.s32.totalorder %s248_s13, 1 }
   0xe   : > { %p495_p9 = por %p77_p6, %p45_p1  ;;  %p272_p13 = scmp.lt.s32.totalorder %s430_s11, 2 }
   0xf   : > { %s500_s20 = scalar_select %p36_p7, %s418_s8, %s38_s15  }
  0x10   : > { %p502_p11 = por %p83_p10, %p51_p3  ;;  %s103_s22 = sand.u32 1, %s418_s8  }
  0x11   : > { %s251_s23 = sshll.u32 %s103_s22, 3  ;;  %s252_s24 = sshll.u32 %s426_s10, 7 }
  0x12   : > { %s589_s21 = scalar_select %p502_p11, 1, 0 }
  0x13   : > { %s113_s27 = scalar_lea.hbm %s584_s0, %s252_s24  ;;  %s107_s28 = scalar_lea.vmem [#allocation2], %s251_s23 }
  0x14   : > { %s115_s29 = sshll.u32 %s107_s28, 4  ;;  %p515_p0 = pnand %p272_p13, %p485_p4  ;;  %s116_s29 = int_to_ptr.vmem [resolvable:$true] %s115_s29 }
  0x15   : > { %p253_p1 = scmp.ge.s32.totalorder %s430_s11, 1  ;;  %p120_p2 = scmp.lt.s32.totalorder %s430_s11, 3 }
  0x16   : > { %s104_s2 = scalar_lea.sflag [#allocation3], %s103_s22  ;;  %p324_p3 = pneg %p515_p0 }
  0x17   : > { %s335_s3 = scalar_lea.vmem %s116_s29, 128  ;;  %s432_s4 = smov [#allocation2]  }
  0x18   : > { %p336_p5 = scmp.ne.s32.totalorder %s116_s29, %s335_s3  ;;  %s340_s5 = sshll.u32 %s432_s4, 4  ;;  %s341_s5 = int_to_ptr.vmem [resolvable:$false] %s340_s5 }
  0x19   : > { %s342_s12 = scalar_lea.vmem %s341_s5, 256  ;;  %p343_p10 = scmp.lt.s32.totalorder %s116_s29, %s341_s5 }
  0x1a   : > { %p338_p6 = pnand %p336_p5, %p324_p3  ;;  %p344_p12 = scmp.lt.s32.totalorder %s342_s12, %s335_s3 }
  0x1c   : > { %p339_p7 = pneg %p338_p6  ;;  %p345_p4 = por %p344_p12, %p343_p10 }
  0x1e   : > { %p346_p13 = pnand %p345_p4, %p339_p7 }
  0x20   : > { %349 = shalt.err (!%p346_p13)
}
  0x21   : > { %267 = dma.hbm_to_vmem [thread:$0]  (!%p515_p0), %s113_s27, 128, %s116_s29, %s104_s2  }
  0x22   : > { %p121_p11 = pnand %p253_p1, %p120_p2 }
  0x23   : > { %s530_s13 = sand.u32 (!%p121_p11), 1, %s414_s7  }
  0x24   : > { %124 = sbr.rel (%p121_p11) target bundleno = 66 (0x42), region = 24  ;;  %s254_s15 = sshll.u32 (!%p121_p11), %s530_s13, 3 }
  0x25   : > { %s127_s16 = scalar_lea.sflag (!%p121_p11), [#allocation3], %s530_s13  ;;  %s130_s17 = scalar_lea.vmem (!%p121_p11), [#allocation2], %s254_s15 }
  0x29   : > { %401 = dma.done.wait (%p491_p8), %s127_s16, 128  }
  0x2a   : > { %403 = vsyncadd (%p491_p8), %s127_s16, 4294967168  ;;  %s148_s22 = scalar_lea.vmem [#allocation5], %s254_s15  ;;  %s257_s24 = sshll.u32 %s422_s9, 7  ;;  %vm150_vm0 = vcmask 261120   ;;  %v149_v0 = vld [vmem:[%s130_s17] sm:$0xff] }
  0x2b   : > { %s167_s23 = sshll.u32 %s148_s22, 4  ;;  %s165_s27 = scalar_lea.hbm %s585_s1, %s257_s24  ;;  %151 = vst.msk [vmem:[%s148_s22] sm:$0xff] %vm150_vm0, %v149_v0  ;;  %s539_s23 = int_to_ptr.vmem [resolvable:$true] %s167_s23 }
  0x2c   : > { %s153_s18 = scalar_lea.sflag [#allocation4], %s530_s13  ;;  %s350_s28 = scalar_lea.vmem %s539_s23, 128 }
  0x2d   : > { %p351_p8 = scmp.ne.s32.totalorder %s539_s23, %s350_s28  ;;  %s433_s29 = smov [#allocation5]  }
  0x2e   : > { %s354_s9 = sshll.u32 %s433_s29, 4  ;;  %s355_s9 = int_to_ptr.vmem [resolvable:$false] %s354_s9 }
  0x2f   : > { %p352_p11 = pnand %p351_p8, %p495_p9  ;;  %s356_s30 = scalar_lea.vmem %s355_s9, 256 }
  0x30   : > { %p357_p0 = scmp.lt.s32.totalorder %s539_s23, %s355_s9  ;;  %p358_p1 = scmp.lt.s32.totalorder %s356_s30, %s350_s28 }
  0x31   : > { %p353_p12 = pneg %p352_p11 }
  0x32   : > { %p359_p2 = por %p358_p1, %p357_p0 }
  0x34   : > { %p360_p3 = pnand %p359_p2, %p353_p12 }
  0x36   : > { %363 = shalt.err (!%p360_p3)
}
  0x37   : > { %s364_s2 = scalar_lea.hbm %s165_s27, 128  ;;  %s368_s5 = scalar_lea.hbm %s585_s1, 256 }
  0x38   : > { %p365_p5 = scmp.ne.s32.totalorder %s165_s27, %s364_s2  ;;  %p369_p10 = scmp.lt.s32.totalorder %s165_s27, %s585_s1 }
  0x39   : > { %p370_p4 = scmp.lt.s32.totalorder %s368_s5, %s364_s2 }
  0x3a   : > { %p366_p6 = pnand %p365_p5, %p495_p9 }
  0x3b   : > { %p371_p13 = por %p370_p4, %p369_p10 }
  0x3c   : > { %p367_p7 = pneg %p366_p6 }
  0x3e   : > { %p372_p8 = pnand %p371_p13, %p367_p7 }
  0x40   : > { %375 = shalt.err (!%p372_p8)
}
  0x41   : > { %262 = dma.vmem_to_hbm [thread:$0]  (%p495_p9), %s539_s23, 128, %s165_s27, %s153_s18  }
  0x42 PF: > { %s179_s15 = sand.u32 1, %s410_s6   ;;  %p591_p11 = scmp.ne.s32.totalorder %s589_s21, 0 }
  0x43   : > { %p592_p12 = scmp.ge.s32.totalorder %s430_s11, 2  ;;  %s180_s16 = scalar_lea.sflag [#allocation4], %s179_s15 }
  0x45   : > { %p269_p0 = pnand %p592_p12, %p591_p11 }
  0x47   : > { %p270_p1 = pneg %p269_p0 }
  0x49   : > { %405 = dma.done.wait (%p270_p1), %s180_s16, 128  }
  0x4a   : > { %407 = vsyncadd (%p270_p1), %s180_s16, 4294967168  ;;  %s17_s11 = sadd.s32 1, %s430_s11   ;;  %s593_s6 = smov %s414_s7 }
  0x4b   : > { %p14_p2 = scmp.ge.s32.totalorder %s17_s11, 4   ;;  %s594_s7 = smov %s418_s8 }
  0x4c   : > { %s595_s8 = smov %s500_s20  ;;  %s596_s9 = smov %s426_s10 }
  0x4d   : > { %s597_s10 = smov %s599_s14  ;;  %16 = sbr.rel (!%p14_p2) target bundleno = 6 (0x6), region = 69 }
  0x52   :  { %185 = vsyncpa [#allocation3], 1 }
  0x53   :  { %187 = vsyncpa [#allocation3 + $0x1], 1 }
  0x54   :  { %188 = vsyncpa [#allocation4], 1 }
  0x55   :  { %190 = vsyncpa [#allocation4 + $0x1], 1 }

</bundles_post_ra>
